<compile_context>
chip_gen: v5e
topology: v5e:2x2
jax: 0.10.0
libtpu: 0.0.40
codegen_flags: <defaults>
</compile_context>

<pallas_src>
import math

import jax
import jax.numpy as jnp
from jax.experimental import pallas as pl
from jax.experimental.pallas import tpu as pltpu


# --------------------------------------------------------------------------------------
# Kernel
# --------------------------------------------------------------------------------------
def _unet_mlp_kernel_factory(eps: float, skip_scale: float,
                             adaptive_scale: bool, has_skip: bool):
    def kernel(x_ref, emb_ref,
               g0_ref, be0_ref,             # norm0 gamma/beta   [1, fin]        (f32)
               w0_ref, b0_ref,              # fc0                [fin, fout] bf16, [1, fout] f32
               *rest):
        if adaptive_scale:
            was_ref, bas_ref, wsh_ref, bsh_ref = rest[:4]   # affine split: scale | shift halves
            rest = rest[4:]
        else:
            wa_ref, ba_ref = rest[:2]
            rest = rest[2:]
        g1_ref, be1_ref, w1_ref, b1_ref = rest[:4]
        rest = rest[4:]
        if has_skip:
            wsk_ref, bsk_ref, o_ref = rest
        else:
            (o_ref,) = rest

        f32 = jnp.float32

        x = x_ref[...].astype(f32)           # [TB, fin]
        emb = emb_ref[...].astype(f32)       # [TB, femb]

        def layernorm(v, g_ref, b_ref):      # f32 math; rsqrt -> EUP slot
            mu = jnp.mean(v, axis=-1, keepdims=True)
            vc = v - mu
            var = jnp.mean(vc * vc, axis=-1, keepdims=True)
            return vc * jax.lax.rsqrt(var + eps) * g_ref[...] + b_ref[...]

        def silu(v):                         # sigmoid exp -> EUP slot
            return v * jax.nn.sigmoid(v)

        def mxu(a_f32, w_ref, b_ref):        # bf16 operands, f32 accumulation, f32 bias add
            return jnp.dot(a_f32.astype(jnp.bfloat16), w_ref[...],
                           preferred_element_type=f32) + b_ref[...]

        # h = fc0(silu(norm0(x)))
        h = mxu(silu(layernorm(x, g0_ref, be0_ref)), w0_ref, b0_ref)

        if adaptive_scale:
            # params = affine(emb); scale, shift = params.chunk(2, dim=1)
            # (scale = first half of affine columns, shift = second half — host-side split)
            scale = mxu(emb, was_ref, bas_ref)
            shift = mxu(emb, wsh_ref, bsh_ref)
            hn = layernorm(h, g1_ref, be1_ref)
            y = silu(shift + hn * (scale + 1.0))          # addcmul(shift, norm1(h), scale+1)
        else:
            p = mxu(emb, wa_ref, ba_ref)
            y = silu(layernorm(h + p, g1_ref, be1_ref))

        # fc1(dropout(y)) — dropout p=0 / eval mode => identity.
        # TODO(synk): dropout p>0 in training mode would need pltpu.prng_* masking.
        y = mxu(y, w1_ref, b1_ref)

        # residual
        sk = mxu(x, wsk_ref, bsk_ref) if has_skip else x
        o_ref[...] = ((y + sk) * skip_scale).astype(o_ref.dtype)

    return kernel


# --------------------------------------------------------------------------------------
# Wrapper
# --------------------------------------------------------------------------------------
def _choose_batch_tile(batch, block_b, target_steps=4):
    """Sublane-aligned batch tile that leaves >= target_steps grid steps when possible."""
    tb = max(1, min(int(block_b), batch))
    if batch >= 8:
        gran = 16 if (batch % 16 == 0 and tb >= 16) else 8
        tb = max(gran, (tb // gran) * gran)
        while tb > gran and -(-batch // tb) < target_steps:
            tb = max(gran, ((tb // 2) // gran) * gran)
    return tb


def _resident_spec(arr):
    """Full-shape, constant-index BlockSpec: weight stays resident in VMEM.
    Single-buffered (Buffered(1)) — halves weight VMEM vs. the default double buffer."""
    ndim = arr.ndim
    index_map = lambda i, _n=ndim: (0,) * _n
    try:
        return pl.BlockSpec(arr.shape, index_map,
                            pipeline_mode=pl.Buffered(buffer_count=1))
    except (TypeError, AttributeError):       # older jax: no pipeline_mode / Buffered
        return pl.BlockSpec(arr.shape, index_map)


def unet_mlp_block_forward(x, emb, params, *, eps=1e-5, skip_scale=1.0,
                           adaptive_scale=True, dropout=0.0, training=False,
                           block_b=256):
    """Pallas forward for UNetMLPBlock. x: [B, fin], emb: [B, femb]."""
    if training and dropout > 0.0:
        # TODO(synk): implement training-mode dropout with pltpu.prng_seed/prng_random_bits.
        raise NotImplementedError("dropout > 0 in training mode is not implemented")

    B, fin = x.shape
    femb = emb.shape[1]
    fout = params["w0"].shape[1]
    has_skip = "wsk" in params

    bf16, f32 = jnp.bfloat16, jnp.float32

    # Matmul weights -> bf16 (one-time; folded under jit). LN params / biases stay f32.
    w0 = params["w0"].astype(bf16)
    w1 = params["w1"].astype(bf16)
    wa = params["wa"].astype(bf16)
    b0 = params["b0"].astype(f32)
    b1 = params["b1"].astype(f32)
    ba = params["ba"].astype(f32)
    g0, beta0 = params["g0"].astype(f32), params["beta0"].astype(f32)
    g1, beta1 = params["g1"].astype(f32), params["beta1"].astype(f32)

    if adaptive_scale:
        # torch.chunk(2, dim=1): scale = columns [:fout], shift = columns [fout:].
        # Splitting host-side keeps each half a lane-aligned standalone matmul in-kernel.
        affine_args = [wa[:, :fout], ba[:, :fout], wa[:, fout:], ba[:, fout:]]
    else:
        affine_args = [wa, ba]

    weight_args = [g0, beta0, w0, b0] + affine_args + [g1, beta1, w1, b1]
    if has_skip:
        weight_args += [params["wsk"].astype(bf16), params["bsk"].astype(f32)]

    # --- batch tiling -----------------------------------------------------------------
    TB = _choose_batch_tile(B, block_b)
    Bp = ((B + TB - 1) // TB) * TB
    if Bp != B:                               # pad only if TB does not divide B
        x = jnp.pad(x, ((0, Bp - B), (0, 0)))
        emb = jnp.pad(emb, ((0, Bp - B), (0, 0)))
    grid = (Bp // TB,)

    def tile_spec(f):
        return pl.BlockSpec((TB, f), lambda i: (i, 0))

    in_specs = [tile_spec(fin), tile_spec(femb)] + [_resident_spec(w) for w in weight_args]

    # --- VMEM budget: single-buffered weights + double-buffered activation tiles -------
    weight_bytes = sum(int(a.size) * a.dtype.itemsize for a in weight_args)
    act_tile_bytes = TB * (fin * x.dtype.itemsize + femb * emb.dtype.itemsize + fout * 4)
    vmem_needed = weight_bytes + 2 * act_tile_bytes
    try:
        vmem_cap = int(pltpu.get_tpu_info().vmem_capacity_bytes)
    except Exception:
        vmem_cap = 64 * 1024 * 1024           # conservative (v7x per-TC) floor
    vmem_limit = int(min(max(vmem_needed + (8 << 20), 32 << 20), vmem_cap))

    # --- advisory cost estimate for XLA scheduling --------------------------------------
    n_aff = 2 if adaptive_scale else 1
    flops = 2 * B * (fin * fout * (2 if has_skip else 1) + femb * fout * n_aff + fout * fout)
    transcendentals = B * (fin + 2 * fout)    # sigmoid/rsqrt, rough
    bytes_accessed = (int(x.size) * x.dtype.itemsize + int(emb.size) * emb.dtype.itemsize
                      + B * fout * 4 + weight_bytes)
    cost = pl.CostEstimate(flops=int(flops), transcendentals=int(transcendentals),
                           bytes_accessed=int(bytes_accessed))

    kernel = _unet_mlp_kernel_factory(float(eps), float(skip_scale),
                                      bool(adaptive_scale), has_skip)

    out = pl.pallas_call(
        kernel,
        out_shape=jax.ShapeDtypeStruct((Bp, fout), f32),
        grid=grid,
        in_specs=in_specs,
        out_specs=tile_spec(fout),
        compiler_params=pltpu.CompilerParams(
            dimension_semantics=("parallel",),
            vmem_limit_bytes=vmem_limit),
        cost_estimate=cost,
    )(x, emb, *weight_args)
    return out if Bp == B else out[:B]


# --------------------------------------------------------------------------------------
# Params init + pure-JAX reference
# --------------------------------------------------------------------------------------
def init_params(key, in_features, out_features, emb_features, adaptive_scale=True):
    """PyTorch-Linear-like uniform init; weights pre-transposed to [in, out]."""
    ks = jax.random.split(key, 12)

    def linear(kw, kb, fi, fo):
        bound = 1.0 / math.sqrt(fi)
        w = jax.random.uniform(kw, (fi, fo), jnp.float32, -bound, bound)
        b = jax.random.uniform(kb, (1, fo), jnp.float32, -bound, bound)
        return w, b

    aff_out = out_features * (2 if adaptive_scale else 1)
    w0, b0 = linear(ks[0], ks[1], in_features, out_features)
    wa, ba = linear(ks[2], ks[3], emb_features, aff_out)
    w1, b1 = linear(ks[4], ks[5], out_features, out_features)
    g0 = 1.0 + 0.1 * jax.random.normal(ks[6], (1, in_features), jnp.float32)
    beta0 = 0.1 * jax.random.normal(ks[7], (1, in_features), jnp.float32)
    g1 = 1.0 + 0.1 * jax.random.normal(ks[8], (1, out_features), jnp.float32)
    beta1 = 0.1 * jax.random.normal(ks[9], (1, out_features), jnp.float32)
    params = dict(g0=g0, beta0=beta0, w0=w0, b0=b0, wa=wa, ba=ba,
                  g1=g1, beta1=beta1, w1=w1, b1=b1)
    if out_features != in_features:
        wsk, bsk = linear(ks[10], ks[11], in_features, out_features)
        params.update(wsk=wsk, bsk=bsk)
    return params


def reference_forward(x, emb, params, *, eps=1e-5, skip_scale=1.0, adaptive_scale=True,
                      matmul_dtype=jnp.bfloat16):
    """Pure-JAX reference mirroring PyTorch UNetMLPBlock.forward, with the same
    bf16-operand / f32-accumulate matmul policy as the kernel."""
    def mm(a, w, b):
        return jnp.dot(a.astype(matmul_dtype), w.astype(matmul_dtype),
                       preferred_element_type=jnp.float32) + b

    def ln(v, g, b):
        mu = jnp.mean(v, -1, keepdims=True)
        var = jnp.mean((v - mu) ** 2, -1, keepdims=True)
        return (v - mu) * jax.lax.rsqrt(var + eps) * g + b

    def silu(v):
        return v * jax.nn.sigmoid(v)

    fout = params["w0"].shape[1]
    orig = x
    h = mm(silu(ln(x, params["g0"], params["beta0"])), params["w0"], params["b0"])
    p = mm(emb, params["wa"], params["ba"])
    if adaptive_scale:
        scale, shift = p[:, :fout], p[:, fout:]          # torch.chunk(2, dim=1)
        h = silu(shift + ln(h, params["g1"], params["beta1"]) * (scale + 1.0))
    else:
        h = silu(ln(h + p, params["g1"], params["beta1"]))
    h = mm(h, params["w1"], params["b1"])
    sk = mm(orig, params["wsk"], params["bsk"]) if "wsk" in params else orig
    return (h + sk) * skip_scale


# --------------------------------------------------------------------------------------
# Demo / self-check
# --------------------------------------------------------------------------------------
if __name__ == "__main__":
    key = jax.random.PRNGKey(0)
    kx, ke, kp, kp2 = jax.random.split(key, 4)

    # Small demo shapes (module defaults: adaptive_scale=True, dropout=0).
    B, FIN, FOUT, FEMB = 64, 32, 64, 16
    x = jax.random.normal(kx, (B, FIN), jnp.float32)
    emb = jax.random.normal(ke, (B, FEMB), jnp.float32)

    # Config 1: out != in  -> learned skip Linear, adaptive_scale=True.
    params = init_params(kp, FIN, FOUT, FEMB, adaptive_scale=True)
    out = unet_mlp_block_forward(x, emb, params, skip_scale=1.0, adaptive_scale=True)
    out = jax.block_until_ready(out)
    ref = reference_forward(x, emb, params, skip_scale=1.0, adaptive_scale=True)
    assert out.shape == (B, FOUT)
    assert jnp.allclose(out, ref, atol=1e-2, rtol=1e-2), float(jnp.max(jnp.abs(out - ref)))

    # Config 2: out == in -> identity skip, adaptive_scale=False, skip_scale=1/sqrt(2).
    params2 = init_params(kp2, FIN, FIN, FEMB, adaptive_scale=False)
    ss = 1.0 / math.sqrt(2.0)
    out2 = unet_mlp_block_forward(x, emb, params2, skip_scale=ss, adaptive_scale=False)
    out2 = jax.block_until_ready(out2)
    ref2 = reference_forward(x, emb, params2, skip_scale=ss, adaptive_scale=False)
    assert out2.shape == (B, FIN)
    assert jnp.allclose(out2, ref2, atol=1e-2, rtol=1e-2), float(jnp.max(jnp.abs(out2 - ref2)))

    print("KERNEL_OK")
</pallas_src>

<mosaic_0001>
module attributes {stable_mosaic.version = 11 : i64} {
  func.func @kernel(%arg0: i32, %arg1: memref<16x32xf32, #tpu.memory_space<vmem>>, %arg2: memref<16x16xf32, #tpu.memory_space<vmem>>, %arg3: memref<1x32xf32, #tpu.memory_space<vmem>>, %arg4: memref<1x32xf32, #tpu.memory_space<vmem>>, %arg5: memref<32x64xbf16, #tpu.memory_space<vmem>>, %arg6: memref<1x64xf32, #tpu.memory_space<vmem>>, %arg7: memref<16x64xbf16, #tpu.memory_space<vmem>>, %arg8: memref<1x64xf32, #tpu.memory_space<vmem>>, %arg9: memref<16x64xbf16, #tpu.memory_space<vmem>>, %arg10: memref<1x64xf32, #tpu.memory_space<vmem>>, %arg11: memref<1x64xf32, #tpu.memory_space<vmem>>, %arg12: memref<1x64xf32, #tpu.memory_space<vmem>>, %arg13: memref<64x64xbf16, #tpu.memory_space<vmem>>, %arg14: memref<1x64xf32, #tpu.memory_space<vmem>>, %arg15: memref<32x64xbf16, #tpu.memory_space<vmem>>, %arg16: memref<1x64xf32, #tpu.memory_space<vmem>>, %arg17: memref<16x64xf32, #tpu.memory_space<vmem>>) attributes {dimension_semantics = [#tpu.dimension_semantics<parallel>], iteration_bounds = array<i64: 4>, scalar_prefetch = 0 : i64, scratch_operands = 0 : i64, tpu.core_type = #tpu.core_type<tc>, window_params = [{transform_indices = @transform_0, window_bounds = array<i64: 16, 32>}, {transform_indices = @transform_1, window_bounds = array<i64: 16, 16>}, {pipeline_mode = #tpu.pipeline_mode<synchronous>, transform_indices = @transform_2, window_bounds = array<i64: 1, 32>}, {pipeline_mode = #tpu.pipeline_mode<synchronous>, transform_indices = @transform_3, window_bounds = array<i64: 1, 32>}, {pipeline_mode = #tpu.pipeline_mode<synchronous>, transform_indices = @transform_4, window_bounds = array<i64: 32, 64>}, {pipeline_mode = #tpu.pipeline_mode<synchronous>, transform_indices = @transform_5, window_bounds = array<i64: 1, 64>}, {pipeline_mode = #tpu.pipeline_mode<synchronous>, transform_indices = @transform_6, window_bounds = array<i64: 16, 64>}, {pipeline_mode = #tpu.pipeline_mode<synchronous>, transform_indices = @transform_7, window_bounds = array<i64: 1, 64>}, {pipeline_mode = #tpu.pipeline_mode<synchronous>, transform_indices = @transform_8, window_bounds = array<i64: 16, 64>}, {pipeline_mode = #tpu.pipeline_mode<synchronous>, transform_indices = @transform_9, window_bounds = array<i64: 1, 64>}, {pipeline_mode = #tpu.pipeline_mode<synchronous>, transform_indices = @transform_10, window_bounds = array<i64: 1, 64>}, {pipeline_mode = #tpu.pipeline_mode<synchronous>, transform_indices = @transform_11, window_bounds = array<i64: 1, 64>}, {pipeline_mode = #tpu.pipeline_mode<synchronous>, transform_indices = @transform_12, window_bounds = array<i64: 64, 64>}, {pipeline_mode = #tpu.pipeline_mode<synchronous>, transform_indices = @transform_13, window_bounds = array<i64: 1, 64>}, {pipeline_mode = #tpu.pipeline_mode<synchronous>, transform_indices = @transform_14, window_bounds = array<i64: 32, 64>}, {pipeline_mode = #tpu.pipeline_mode<synchronous>, transform_indices = @transform_15, window_bounds = array<i64: 1, 64>}, {transform_indices = @transform_16, window_bounds = array<i64: 16, 64>}]} {
    %c0 = arith.constant 0 : index
    %c0_0 = arith.constant 0 : index
    %0 = vector.load %arg1[%c0, %c0_0] : memref<16x32xf32, #tpu.memory_space<vmem>>, vector<16x32xf32>
    %c0_1 = arith.constant 0 : index
    %c0_2 = arith.constant 0 : index
    %1 = vector.load %arg2[%c0_1, %c0_2] : memref<16x16xf32, #tpu.memory_space<vmem>>, vector<16x16xf32>
    %cst = arith.constant dense<0.000000e+00> : vector<16xf32>
    %2 = vector.multi_reduction <add>, %0, %cst [1] : vector<16x32xf32> to vector<16xf32>
    %3 = vector.shape_cast %2 : vector<16xf32> to vector<16x1xf32>
    %cst_3 = arith.constant 3.200000e+01 : f32
    %4 = vector.broadcast %cst_3 : f32 to vector<16x1xf32>
    %5 = arith.divf %3, %4 : vector<16x1xf32>
    %6 = vector.broadcast %5 : vector<16x1xf32> to vector<16x32xf32>
    %7 = arith.subf %0, %6 : vector<16x32xf32>
    %8 = arith.mulf %7, %7 : vector<16x32xf32>
    %cst_4 = arith.constant dense<0.000000e+00> : vector<16xf32>
    %9 = vector.multi_reduction <add>, %8, %cst_4 [1] : vector<16x32xf32> to vector<16xf32>
    %10 = vector.shape_cast %9 : vector<16xf32> to vector<16x1xf32>
    %cst_5 = arith.constant 3.200000e+01 : f32
    %11 = vector.broadcast %cst_5 : f32 to vector<16x1xf32>
    %12 = arith.divf %10, %11 : vector<16x1xf32>
    %cst_6 = arith.constant 9.99999974E-6 : f32
    %13 = vector.broadcast %cst_6 : f32 to vector<16x1xf32>
    %14 = arith.addf %12, %13 : vector<16x1xf32>
    %15 = math.rsqrt %14 : vector<16x1xf32>
    %16 = vector.broadcast %15 : vector<16x1xf32> to vector<16x32xf32>
    %17 = arith.mulf %7, %16 : vector<16x32xf32>
    %c0_7 = arith.constant 0 : index
    %c0_8 = arith.constant 0 : index
    %18 = vector.load %arg3[%c0_7, %c0_8] : memref<1x32xf32, #tpu.memory_space<vmem>>, vector<1x32xf32>
    %19 = vector.broadcast %18 : vector<1x32xf32> to vector<16x32xf32>
    %20 = arith.mulf %17, %19 : vector<16x32xf32>
    %c0_9 = arith.constant 0 : index
    %c0_10 = arith.constant 0 : index
    %21 = vector.load %arg4[%c0_9, %c0_10] : memref<1x32xf32, #tpu.memory_space<vmem>>, vector<1x32xf32>
    %22 = vector.broadcast %21 : vector<1x32xf32> to vector<16x32xf32>
    %23 = arith.addf %20, %22 : vector<16x32xf32>
    %24 = arith.negf %23 : vector<16x32xf32>
    %25 = math.exp %24 : vector<16x32xf32>
    %cst_11 = arith.constant 1.000000e+00 : f32
    %26 = vector.broadcast %cst_11 : f32 to vector<16x32xf32>
    %27 = arith.addf %26, %25 : vector<16x32xf32>
    %28 = arith.divf %26, %27 : vector<16x32xf32>
    %29 = arith.mulf %23, %28 : vector<16x32xf32>
    %30 = arith.truncf %29 : vector<16x32xf32> to vector<16x32xbf16>
    %c0_12 = arith.constant 0 : index
    %c0_13 = arith.constant 0 : index
    %31 = vector.load %arg5[%c0_12, %c0_13] : memref<32x64xbf16, #tpu.memory_space<vmem>>, vector<32x64xbf16>
    %cst_14 = arith.constant dense<0.000000e+00> : vector<16x64xf32>
    %32 = tpu.matmul %30, %31, %cst_14 {dimension_numbers = #tpu.dot_dimension_numbers<[1], [0], [0], [1], [0, 0, 1, 1], [], []>} : vector<16x32xbf16>, vector<32x64xbf16>, vector<16x64xf32> -> vector<16x64xf32>
    %c0_15 = arith.constant 0 : index
    %c0_16 = arith.constant 0 : index
    %33 = vector.load %arg6[%c0_15, %c0_16] : memref<1x64xf32, #tpu.memory_space<vmem>>, vector<1x64xf32>
    %34 = vector.broadcast %33 : vector<1x64xf32> to vector<16x64xf32>
    %35 = arith.addf %32, %34 : vector<16x64xf32>
    %36 = arith.truncf %1 : vector<16x16xf32> to vector<16x16xbf16>
    %c0_17 = arith.constant 0 : index
    %c0_18 = arith.constant 0 : index
    %37 = vector.load %arg7[%c0_17, %c0_18] : memref<16x64xbf16, #tpu.memory_space<vmem>>, vector<16x64xbf16>
    %cst_19 = arith.constant dense<0.000000e+00> : vector<16x64xf32>
    %38 = tpu.matmul %36, %37, %cst_19 {dimension_numbers = #tpu.dot_dimension_numbers<[1], [0], [0], [1], [0, 0, 1, 1], [], []>} : vector<16x16xbf16>, vector<16x64xbf16>, vector<16x64xf32> -> vector<16x64xf32>
    %c0_20 = arith.constant 0 : index
    %c0_21 = arith.constant 0 : index
    %39 = vector.load %arg8[%c0_20, %c0_21] : memref<1x64xf32, #tpu.memory_space<vmem>>, vector<1x64xf32>
    %40 = vector.broadcast %39 : vector<1x64xf32> to vector<16x64xf32>
    %41 = arith.addf %38, %40 : vector<16x64xf32>
    %42 = arith.truncf %1 : vector<16x16xf32> to vector<16x16xbf16>
    %c0_22 = arith.constant 0 : index
    %c0_23 = arith.constant 0 : index
    %43 = vector.load %arg9[%c0_22, %c0_23] : memref<16x64xbf16, #tpu.memory_space<vmem>>, vector<16x64xbf16>
    %cst_24 = arith.constant dense<0.000000e+00> : vector<16x64xf32>
    %44 = tpu.matmul %42, %43, %cst_24 {dimension_numbers = #tpu.dot_dimension_numbers<[1], [0], [0], [1], [0, 0, 1, 1], [], []>} : vector<16x16xbf16>, vector<16x64xbf16>, vector<16x64xf32> -> vector<16x64xf32>
    %c0_25 = arith.constant 0 : index
    %c0_26 = arith.constant 0 : index
    %45 = vector.load %arg10[%c0_25, %c0_26] : memref<1x64xf32, #tpu.memory_space<vmem>>, vector<1x64xf32>
    %46 = vector.broadcast %45 : vector<1x64xf32> to vector<16x64xf32>
    %47 = arith.addf %44, %46 : vector<16x64xf32>
    %cst_27 = arith.constant dense<0.000000e+00> : vector<16xf32>
    %48 = vector.multi_reduction <add>, %35, %cst_27 [1] : vector<16x64xf32> to vector<16xf32>
    %49 = vector.shape_cast %48 : vector<16xf32> to vector<16x1xf32>
    %cst_28 = arith.constant 6.400000e+01 : f32
    %50 = vector.broadcast %cst_28 : f32 to vector<16x1xf32>
    %51 = arith.divf %49, %50 : vector<16x1xf32>
    %52 = vector.broadcast %51 : vector<16x1xf32> to vector<16x64xf32>
    %53 = arith.subf %35, %52 : vector<16x64xf32>
    %54 = arith.mulf %53, %53 : vector<16x64xf32>
    %cst_29 = arith.constant dense<0.000000e+00> : vector<16xf32>
    %55 = vector.multi_reduction <add>, %54, %cst_29 [1] : vector<16x64xf32> to vector<16xf32>
    %56 = vector.shape_cast %55 : vector<16xf32> to vector<16x1xf32>
    %cst_30 = arith.constant 6.400000e+01 : f32
    %57 = vector.broadcast %cst_30 : f32 to vector<16x1xf32>
    %58 = arith.divf %56, %57 : vector<16x1xf32>
    %cst_31 = arith.constant 9.99999974E-6 : f32
    %59 = vector.broadcast %cst_31 : f32 to vector<16x1xf32>
    %60 = arith.addf %58, %59 : vector<16x1xf32>
    %61 = math.rsqrt %60 : vector<16x1xf32>
    %62 = vector.broadcast %61 : vector<16x1xf32> to vector<16x64xf32>
    %63 = arith.mulf %53, %62 : vector<16x64xf32>
    %c0_32 = arith.constant 0 : index
    %c0_33 = arith.constant 0 : index
    %64 = vector.load %arg11[%c0_32, %c0_33] : memref<1x64xf32, #tpu.memory_space<vmem>>, vector<1x64xf32>
    %65 = vector.broadcast %64 : vector<1x64xf32> to vector<16x64xf32>
    %66 = arith.mulf %63, %65 : vector<16x64xf32>
    %c0_34 = arith.constant 0 : index
    %c0_35 = arith.constant 0 : index
    %67 = vector.load %arg12[%c0_34, %c0_35] : memref<1x64xf32, #tpu.memory_space<vmem>>, vector<1x64xf32>
    %68 = vector.broadcast %67 : vector<1x64xf32> to vector<16x64xf32>
    %69 = arith.addf %66, %68 : vector<16x64xf32>
    %cst_36 = arith.constant 1.000000e+00 : f32
    %70 = vector.broadcast %cst_36 : f32 to vector<16x64xf32>
    %71 = arith.addf %41, %70 : vector<16x64xf32>
    %72 = arith.mulf %69, %71 : vector<16x64xf32>
    %73 = arith.addf %47, %72 : vector<16x64xf32>
    %74 = arith.negf %73 : vector<16x64xf32>
    %75 = math.exp %74 : vector<16x64xf32>
    %cst_37 = arith.constant 1.000000e+00 : f32
    %76 = vector.broadcast %cst_37 : f32 to vector<16x64xf32>
    %77 = arith.addf %76, %75 : vector<16x64xf32>
    %78 = arith.divf %76, %77 : vector<16x64xf32>
    %79 = arith.mulf %73, %78 : vector<16x64xf32>
    %80 = arith.truncf %79 : vector<16x64xf32> to vector<16x64xbf16>
    %c0_38 = arith.constant 0 : index
    %c0_39 = arith.constant 0 : index
    %81 = vector.load %arg13[%c0_38, %c0_39] : memref<64x64xbf16, #tpu.memory_space<vmem>>, vector<64x64xbf16>
    %cst_40 = arith.constant dense<0.000000e+00> : vector<16x64xf32>
    %82 = tpu.matmul %80, %81, %cst_40 {dimension_numbers = #tpu.dot_dimension_numbers<[1], [0], [0], [1], [0, 0, 1, 1], [], []>} : vector<16x64xbf16>, vector<64x64xbf16>, vector<16x64xf32> -> vector<16x64xf32>
    %c0_41 = arith.constant 0 : index
    %c0_42 = arith.constant 0 : index
    %83 = vector.load %arg14[%c0_41, %c0_42] : memref<1x64xf32, #tpu.memory_space<vmem>>, vector<1x64xf32>
    %84 = vector.broadcast %83 : vector<1x64xf32> to vector<16x64xf32>
    %85 = arith.addf %82, %84 : vector<16x64xf32>
    %86 = arith.truncf %0 : vector<16x32xf32> to vector<16x32xbf16>
    %c0_43 = arith.constant 0 : index
    %c0_44 = arith.constant 0 : index
    %87 = vector.load %arg15[%c0_43, %c0_44] : memref<32x64xbf16, #tpu.memory_space<vmem>>, vector<32x64xbf16>
    %cst_45 = arith.constant dense<0.000000e+00> : vector<16x64xf32>
    %88 = tpu.matmul %86, %87, %cst_45 {dimension_numbers = #tpu.dot_dimension_numbers<[1], [0], [0], [1], [0, 0, 1, 1], [], []>} : vector<16x32xbf16>, vector<32x64xbf16>, vector<16x64xf32> -> vector<16x64xf32>
    %c0_46 = arith.constant 0 : index
    %c0_47 = arith.constant 0 : index
    %89 = vector.load %arg16[%c0_46, %c0_47] : memref<1x64xf32, #tpu.memory_space<vmem>>, vector<1x64xf32>
    %90 = vector.broadcast %89 : vector<1x64xf32> to vector<16x64xf32>
    %91 = arith.addf %88, %90 : vector<16x64xf32>
    %92 = arith.addf %85, %91 : vector<16x64xf32>
    %cst_48 = arith.constant 1.000000e+00 : f32
    %93 = vector.broadcast %cst_48 : f32 to vector<16x64xf32>
    %94 = arith.mulf %92, %93 : vector<16x64xf32>
    %c0_49 = arith.constant 0 : index
    %c0_50 = arith.constant 0 : index
    %95 = vector.load %arg17[%c0_49, %c0_50] : memref<16x64xf32, #tpu.memory_space<vmem>>, vector<16x64xf32>
    tpu.vector_store %arg17[%c0_49, %c0_50], %94 {strides = array<i32>} : memref<16x64xf32, #tpu.memory_space<vmem>>, vector<16x64xf32>,
    return
  }
  func.func @transform_0(%arg0: i32) -> (i32, i32) {
    %c0_i32 = arith.constant 0 : i32
    %c0_i32_0 = arith.constant 0 : i32
    return %arg0, %c0_i32 : i32, i32
  }
  func.func @transform_1(%arg0: i32) -> (i32, i32) {
    %c0_i32 = arith.constant 0 : i32
    %c0_i32_0 = arith.constant 0 : i32
    return %arg0, %c0_i32 : i32, i32
  }
  func.func @transform_2(%arg0: i32) -> (i32, i32) {
    %c0_i32 = arith.constant 0 : i32
    %c0_i32_0 = arith.constant 0 : i32
    %c0_i32_1 = arith.constant 0 : i32
    return %c0_i32, %c0_i32_0 : i32, i32
  }
  func.func @transform_3(%arg0: i32) -> (i32, i32) {
    %c0_i32 = arith.constant 0 : i32
    %c0_i32_0 = arith.constant 0 : i32
    %c0_i32_1 = arith.constant 0 : i32
    return %c0_i32, %c0_i32_0 : i32, i32
  }
  func.func @transform_4(%arg0: i32) -> (i32, i32) {
    %c0_i32 = arith.constant 0 : i32
    %c0_i32_0 = arith.constant 0 : i32
    %c0_i32_1 = arith.constant 0 : i32
    return %c0_i32, %c0_i32_0 : i32, i32
  }
  func.func @transform_5(%arg0: i32) -> (i32, i32) {
    %c0_i32 = arith.constant 0 : i32
    %c0_i32_0 = arith.constant 0 : i32
    %c0_i32_1 = arith.constant 0 : i32
    return %c0_i32, %c0_i32_0 : i32, i32
  }
  func.func @transform_6(%arg0: i32) -> (i32, i32) {
    %c0_i32 = arith.constant 0 : i32
    %c0_i32_0 = arith.constant 0 : i32
    %c0_i32_1 = arith.constant 0 : i32
    return %c0_i32, %c0_i32_0 : i32, i32
  }
  func.func @transform_7(%arg0: i32) -> (i32, i32) {
    %c0_i32 = arith.constant 0 : i32
    %c0_i32_0 = arith.constant 0 : i32
    %c0_i32_1 = arith.constant 0 : i32
    return %c0_i32, %c0_i32_0 : i32, i32
  }
  func.func @transform_8(%arg0: i32) -> (i32, i32) {
    %c0_i32 = arith.constant 0 : i32
    %c0_i32_0 = arith.constant 0 : i32
    %c0_i32_1 = arith.constant 0 : i32
    return %c0_i32, %c0_i32_0 : i32, i32
  }
  func.func @transform_9(%arg0: i32) -> (i32, i32) {
    %c0_i32 = arith.constant 0 : i32
    %c0_i32_0 = arith.constant 0 : i32
    %c0_i32_1 = arith.constant 0 : i32
    return %c0_i32, %c0_i32_0 : i32, i32
  }
  func.func @transform_10(%arg0: i32) -> (i32, i32) {
    %c0_i32 = arith.constant 0 : i32
    %c0_i32_0 = arith.constant 0 : i32
    %c0_i32_1 = arith.constant 0 : i32
    return %c0_i32, %c0_i32_0 : i32, i32
  }
  func.func @transform_11(%arg0: i32) -> (i32, i32) {
    %c0_i32 = arith.constant 0 : i32
    %c0_i32_0 = arith.constant 0 : i32
    %c0_i32_1 = arith.constant 0 : i32
    return %c0_i32, %c0_i32_0 : i32, i32
  }
  func.func @transform_12(%arg0: i32) -> (i32, i32) {
    %c0_i32 = arith.constant 0 : i32
    %c0_i32_0 = arith.constant 0 : i32
    %c0_i32_1 = arith.constant 0 : i32
    return %c0_i32, %c0_i32_0 : i32, i32
  }
  func.func @transform_13(%arg0: i32) -> (i32, i32) {
    %c0_i32 = arith.constant 0 : i32
    %c0_i32_0 = arith.constant 0 : i32
    %c0_i32_1 = arith.constant 0 : i32
    return %c0_i32, %c0_i32_0 : i32, i32
  }
  func.func @transform_14(%arg0: i32) -> (i32, i32) {
    %c0_i32 = arith.constant 0 : i32
    %c0_i32_0 = arith.constant 0 : i32
    %c0_i32_1 = arith.constant 0 : i32
    return %c0_i32, %c0_i32_0 : i32, i32
  }
  func.func @transform_15(%arg0: i32) -> (i32, i32) {
    %c0_i32 = arith.constant 0 : i32
    %c0_i32_0 = arith.constant 0 : i32
    %c0_i32_1 = arith.constant 0 : i32
    return %c0_i32, %c0_i32_0 : i32, i32
  }
  func.func @transform_16(%arg0: i32) -> (i32, i32) {
    %c0_i32 = arith.constant 0 : i32
    %c0_i32_0 = arith.constant 0 : i32
    return %arg0, %c0_i32 : i32, i32
  }
}

</mosaic_0001>

<bundles_post_ra>
// kernel: tpu_custom_call.1
= control target key start
LH: loop header
LB: loop body
LE: loop exit
PB: predicated region body
PF: predicated region fallthrough
CT: control target
= control target key end

     0   :  { %s1526_s0 = inlined_call_operand.vmem [shape: f32[64,32], index: 0, kind: input, shape index: {}]   ;;  %s1527_s1 = inlined_call_operand.vmem [shape: f32[64,16], index: 1, kind: input, shape index: {}]   ;;  %s1528_s2 = inlined_call_operand.vmem [shape: f32[1,32], index: 2, kind: input, shape index: {}]   ;;  %s1529_s3 = inlined_call_operand.vmem [shape: f32[1,32], index: 3, kind: input, shape index: {}]   ;;  %s1530_s4 = inlined_call_operand.vmem [shape: bf16[32,64], index: 4, kind: input, shape index: {}]   ;;  %s1531_s5 = inlined_call_operand.vmem [shape: f32[1,64], index: 5, kind: input, shape index: {}]   ;;  %s1532_s6 = inlined_call_operand.vmem [shape: bf16[16,64], index: 6, kind: input, shape index: {}]   ;;  %s1533_s7 = inlined_call_operand.vmem [shape: f32[1,64], index: 7, kind: input, shape index: {}]   ;;  %s1534_s8 = inlined_call_operand.vmem [shape: bf16[16,64], index: 8, kind: input, shape index: {}]   ;;  %s1535_s9 = inlined_call_operand.vmem [shape: f32[1,64], index: 9, kind: input, shape index: {}]   ;;  %s1536_s10 = inlined_call_operand.vmem [shape: f32[1,64], index: 10, kind: input, shape index: {}]   ;;  %s1537_s11 = inlined_call_operand.vmem [shape: f32[1,64], index: 11, kind: input, shape index: {}]   ;;  %s1538_s12 = inlined_call_operand.vmem [shape: bf16[64,64], index: 12, kind: input, shape index: {}]   ;;  %s1539_s13 = inlined_call_operand.vmem [shape: f32[1,64], index: 13, kind: input, shape index: {}]   ;;  %s1540_s14 = inlined_call_operand.vmem [shape: bf16[32,64], index: 14, kind: input, shape index: {}]   ;;  %s1541_s15 = inlined_call_operand.vmem [shape: f32[1,64], index: 15, kind: input, shape index: {}]   ;;  %s1542_s16 = inlined_call_operand.hbm [shape: f32[64,64], index: 16, kind: output, shape index: {}]  }
   0x1   :  { %1543 = sst [smem:[#allocation5_spill]] %s1526_s0 }
   0x2   :  { %1544 = sst [smem:[#allocation6_spill]] %s1527_s1 }
   0x3   :  { %1545 = sst [smem:[#allocation7_spill]] %s1528_s2 }
   0x4   :  { %1546 = sst [smem:[#allocation8_spill]] %s1529_s3 }
   0x5   :  { %1547 = sst [smem:[#allocation9_spill]] %s1530_s4 }
   0x6   :  { %1548 = sst [smem:[#allocation10_spill]] %s1531_s5 }
   0x7   :  { %21 = vsyncpa [#allocation3], 0 }
   0x8   :  { %23 = vsyncpa [#allocation3 + $0x1], 0  ;;  %s1352_s21 = smov 0   ;;  %s1354_s22 = smov 0  }
   0x9   :  { %s1356_s23 = smov 0   ;;  %s1358_s24 = smov 0  }
   0xa LB: > { %s1373_s25 = sadd.s32 4294967295, %s1261_s24   ;;  %s1045_s26 = sadd.s32 4294967294, %s1261_s24   ;;  %s1261_s24 = sphi %s1358_s24, %s1560_s24   ;;  %s1257_s23 = sphi %s1356_s23, %s1559_s23   ;;  %s1253_s22 = sphi %s1354_s22, %s1558_s22   ;;  %s1249_s21 = sphi %s1352_s21, %s1557_s21  }
   0xb   : > { %s1377_s27 = sadd.s32 1, %s1261_s24   ;;  %s382_s28 = sadd.s32 1, %s1257_s23 }
   0xc   : > { %s379_s29 = ssub.s32 %s1261_s24, %s1377_s27  ;;  %p392_p0 = scmp.ne.s32.totalorder %s1257_s23, %s1253_s22 }
   0xd   : > { %p380_p1 = scmp.eq.s32.totalorder %s379_s29, 0  ;;  %p393_p2 = scmp.eq.s32.totalorder %s1373_s25, 3 }
   0xe   : > { %p398_p3 = scmp.ne.s32.totalorder %s1253_s22, %s1249_s21  ;;  %p399_p4 = scmp.eq.s32.totalorder %s1045_s26, 3 }
   0xf   : > { %s1388_s30 = scalar_select %p380_p1, %s1257_s23, %s382_s28  }
  0x10   : > { %p1390_p5 = por %p393_p2, %p392_p0  ;;  %p1394_p6 = por %p399_p4, %p398_p3 }
  0x11   : > { %p1048_p7 = scmp.ge.s32.totalorder %s1261_s24, 1  ;;  %p477_p8 = scmp.lt.s32.totalorder %s1261_s24, 5 }
  0x13   : > { %p478_p9 = pnand %p1048_p7, %p477_p8 }
  0x14   : > { %s1050_s18 = sshll.u32 (!%p478_p9), %s1373_s25, 1  ;;  %s1551_s28 = sld [smem:[#allocation5_spill]] (!%p478_p9) }
  0x15   : > { %481 = sbr.rel (%p478_p9) target bundleno = 926 (0x39e), region = 84  ;;  %p533_p10 = scmp.lt.s32.totalorder (!%p478_p9), %s1050_s18, 7 }
  0x16   : > { %s1552_s4 = sld [smem:[#allocation9_spill]] (!%p478_p9)  ;;  %s1118_s26 = sshll.u32 (!%p478_p9), %s1373_s25, 4 }
  0x17   : > { %s1553_s2 = sld [smem:[#allocation7_spill]] (!%p478_p9) }
  0x18   : > { %s1554_s3 = sld [smem:[#allocation8_spill]] (!%p478_p9) }
  0x19   : > { %s1555_s5 = sld [smem:[#allocation10_spill]] (!%p478_p9) }
  0x1a   : > { %s1562_s18 = smov (!%p533_p10, %s1050_s18), 7  ;;  %vm550_vm0 = vcmask 261120   ;;  %v1263_v4 = vmov 32.0   ;;  %s1556_s1 = sld [smem:[#allocation6_spill]] }
  0x1b   : > { %s1051_s19 = sshll.u32 %s1562_s18, 3  ;;  %1171 = vrcp.f32 %v1263_v4 }
  0x1c   : > { %s536_s29 = scalar_lea.vmem %s1551_s28, %s1051_s19  ;;  %v1109_v21 = vld [vmem:[%s1552_s4 + $0x8] sm:$0xff]  ;;  %v1108_v24 = vld [vmem:[%s1552_s4] sm:$0xff] }
  0x1d   : > { %v1409_v0 = vld [vmem:[%s536_s29] sm:$0xff]  ;;  %v1413_v2 = vld [vmem:[%s536_s29 + $0x8] sm:$0xff]  ;;  %684 = vmatpush.bf16.msra.mxu0 %v1109_v21 }
  0x1e   : > { %v551_v1 = vsel %vm550_vm0, %v1409_v0, 0.0  ;;  %v554_v3 = vsel %vm550_vm0, %v1413_v2, 0.0  ;;  %v1162_v37 = vld [vmem:[%s1553_s2] ss:$0 sm:$0xff] }
  0x1f   : > { %552 = vadd.xlane.f32.xlu0 %v551_v1  ;;  %v1163_v41 = vld [vmem:[%s1554_s3] ss:$0 sm:$0xff] }
  0x20   : > { %s542_s2 = scalar_lea.vmem %s1556_s1, %s1051_s19  ;;  %s529_s19 = sand.u32 1, %s1253_s22  }
  0x21   : > { %v1172_v5 = vpop.eup %1171  ;;  %685 = vmatpush.bf16.msra.mxu0 %v1108_v24  ;;  %s1049_s20 = sshll.u32 %s529_s19, 4  ;;  %s967_s1 = scalar_lea.hbm %s1542_s16, %s1118_s26 }
  0x22   : > { %v558_v6 = vmul.f32 32.0, %v1172_v5  ;;  %vm562_vm1 = vweird.f32 %v1172_v5  ;;  %s970_s18 = sshll.u32 %s967_s1, 4  ;;  %s956_s25 = scalar_lea.sflag [#allocation3], %s529_s19  ;;  %s971_s18 = int_to_ptr.hbm [resolvable:$true] %s970_s18 }
  0x23   : > { %s1213_s28 = sshra.s32 %s971_s18, 4  ;;  %s1219_s1 = scalar_lea.hbm %s1542_s16, 64  ;;  %s1214_s28 = int_to_ptr.hbm [resolvable:$true] %s1213_s28 }
  0x24   : > { %v559_v7 = vsub.f32 1.0, %v558_v6  ;;  %s1215_s29 = scalar_lea.hbm %s1214_s28, 16  ;;  %p1220_p0 = scmp.lt.s32.totalorder %s1214_s28, %s1542_s16 }
  0x25   : > { %p1216_p11 = scmp.ne.s32.totalorder %s1214_s28, %s1215_s29  ;;  %p1221_p1 = scmp.lt.s32.totalorder %s1219_s1, %s1215_s29 }
  0x26   : > { %v560_v8 = vmul.f32 %v1172_v5, %v559_v7 }
  0x27   : > { %555 = vadd.xlane.f32.xlu0 %v554_v3  ;;  %p1217_p12 = pnand %p1216_p11, %p1390_p5  ;;  %p1222_p2 = por %p1221_p1, %p1220_p0 }
  0x28   : > { %v561_v9 = vadd.f32 %v1172_v5, %v560_v8 }
  0x29   : > { %p1218_p13 = pneg %p1217_p12 }
  0x2a   : > { %v563_v10 = vsel %vm562_vm1, %v1172_v5, %v561_v9  ;;  %vm749_vm1 = vcmask 523264  }
  0x2b   : > { %p1223_p3 = pnand %p1222_p2, %p1218_p13 }
  0x92   : > { %v553_v11 = vpop.xlane.xlu0 %552 }
  0x93   : > { %v564_v12 = vmul.f32 %v563_v10, %v553_v11 }
  0x95   : > { %v566_v13 = vsub.f32 %v1409_v0, %v564_v12 }
  0x97   : > { %v568_v14 = vmul.f32 %v566_v13, %v566_v13 }
  0x99   : > { %v570_v15 = vsel %vm550_vm0, %v568_v14, 0.0 }
  0x9a   : > { %571 = vadd.xlane.f32.xlu1 %v570_v15  ;;  %v556_v16 = vpop.xlane.xlu0 %555 }
  0x9b   : > { %v565_v17 = vmul.f32 %v563_v10, %v556_v16 }
  0x9d   : > { %v567_v18 = vsub.f32 %v1413_v2, %v565_v17 }
  0x9f   : > { %v569_v19 = vmul.f32 %v567_v18, %v567_v18 }
  0xa1   : > { %v573_v20 = vsel %vm550_vm0, %v569_v19, 0.0 }
  0xa2   : > { %574 = vadd.xlane.f32.xlu1 %v573_v20 }
 0x10d   : > { %v572_v22 = vpop.xlane.xlu1 %571 }
 0x10e   : > { %v576_v23 = vmul.f32 %v572_v22, %v563_v10 }
 0x110   : > { %v578_v25 = vadd.f32 1e-05, %v576_v23 }
 0x112   : > { %1173 = vrsqrt.f32 %v578_v25  ;;  %vm586_vm3 = vweird.f32 %v578_v25 }
 0x115   : > { %v575_v26 = vpop.xlane.xlu1 %574 }
 0x116   : > { %v577_v27 = vmul.f32 %v575_v26, %v563_v10  ;;  %v1111_v26 = vld [vmem:[%s1534_s8] sm:$0xff] }
 0x117   : > { %742 = vmatpush.bf16.msra.mxu2 %v1111_v26 }
 0x118   : > { %v1174_v28 = vpop.eup %1173  ;;  %v579_v29 = vadd.f32 1e-05, %v577_v27  ;;  %v1110_v27 = vld [vmem:[%s1532_s6] sm:$0xff] }
 0x119   : > { %v581_v30 = vmul.f32 %v1174_v28, %v578_v25  ;;  %vm587_vm2 = vweird.f32 %v1174_v28  ;;  %v1264_v25 = vmov 64.0   ;;  %716 = vmatpush.bf16.msra.mxu1 %v1110_v27 }
 0x11a   : > { %1175 = vrsqrt.f32 %v579_v29  ;;  %vm588_vm4 = vmor %vm586_vm3, %vm587_vm2  ;;  %vm596_vm6 = vweird.f32 %v579_v29  ;;  %vm705_vm2 = vcmask 130048  }
 0x11b   : > { %v582_v31 = vmul.f32 %v1174_v28, %v581_v30 }
 0x11d   : > { %v583_v32 = vmul.f32 0.5, %v582_v31 }
 0x11f   : > { %v584_v33 = vsub.f32 1.5, %v583_v32 }
 0x120   : > { %v1176_v34 = vpop.eup %1175 }
 0x121   : > { %v585_v35 = vmul.f32 %v1174_v28, %v584_v33  ;;  %v591_v36 = vmul.f32 %v1176_v34, %v579_v29  ;;  %vm597_vm5 = vweird.f32 %v1176_v34  ;;  %v549_v29 = vld [vmem:[%s542_s2 + $0x8] sm:$0xff] }
 0x122   : > { %vm598_vm7 = vmor %vm596_vm6, %vm597_vm5 }
 0x123   : > { %v589_v38 = vsel %vm588_vm4, %v1174_v28, %v585_v35  ;;  %v592_v39 = vmul.f32 %v1176_v34, %v591_v36  ;;  %v548_v28 = vld [vmem:[%s542_s2] sm:$0xff] }
 0x124   : > { %v600_v40 = vmul.f32 %v589_v38, %v566_v13  ;;  %v692_v30 = vpack.c.bf16 %v549_v29, %v548_v28  ;;  %v1116_v29 = vld [vmem:[%s1540_s14] sm:$0xff] }
 0x125   : > { %v593_v42 = vmul.f32 0.5, %v592_v39 }
 0x126   : > { %v606_v43 = vmul.f32 %v1162_v37, %v600_v40  ;;  %1074 = vmatmul.msk.bf16.vlgmr.msra.gmra.mxu2 %vm705_vm2, %v692_v30  ;;  %1069 = vmatmul.msk.bf16.vlgmr.msra.gmra.mxu1 %vm705_vm2, %v692_v30  ;;  %v913_v30 = vpack.c.bf16 %v1413_v2, %v1409_v0 }
 0x127   : > { %v594_v44 = vsub.f32 1.5, %v593_v42 }
 0x128   : > { %v612_v45 = vadd.f32 %v1163_v41, %v606_v43 }
 0x129   : > { %v595_v46 = vmul.f32 %v1176_v34, %v594_v44 }
 0x12a   : > { %v1054_v47 = vmul.f32 -1.442695, %v612_v45 }
 0x12b   : > { %v599_v48 = vsel %vm598_vm7, %v1176_v34, %v595_v46 }
 0x12c   : > { %v601_v49 = vmul.f32 %v599_v48, %v567_v18  ;;  %1177 = vpow2.f32 %v1054_v47  ;;  %v1164_v18 = vld [vmem:[%s1555_s5] ss:$0 sm:$0xff]  ;;  %s531_s5 = scalar_lea.vmem [#allocation2], %s1049_s20 }
 0x12d   : > { %s968_s4 = sshll.u32 %s531_s5, 4  ;;  %s969_s4 = int_to_ptr.vmem [resolvable:$true] %s968_s4 }
 0x12e   : > { %v607_v50 = vmul.f32 %v1162_v37, %v601_v49 }
 0x130   : > { %v613_v51 = vadd.f32 %v1163_v41, %v607_v50 }
 0x132   : > { %v1178_v52 = vpop.eup %1177  ;;  %v1055_v53 = vmul.f32 -1.442695, %v613_v51 }
 0x133   : > { %v620_v54 = vadd.f32 1.0, %v1178_v52 }
 0x134   : > { %1179 = vpow2.f32 %v1055_v53 }
 0x135   : > { %1181 = vrcp.f32 %v620_v54  ;;  %v633_v1 = vand.u32 2147483648, %v620_v54  ;;  %vm627_vm9 = vweird.f32 %v620_v54  ;;  %v631_v3 = vand.u32 2147483647, %v620_v54 }
 0x137   : > { %v634_v9 = vor.u32 1.1754944e-38, %v633_v1  ;;  %vm632_vm12 = vcmp.eq.f32.partialorder %v631_v3, 8.507059e+37  ;;  %v1166_v1 = vld [vmem:[%s1536_s10] ss:$0 sm:$0xff] }
 0x13a   : > { %v1180_v55 = vpop.eup %1179 }
 0x13b   : > { %v1182_v56 = vpop.eup %1181  ;;  %v621_v57 = vadd.f32 1.0, %v1180_v55 }
 0x13c   : > { %v623_v58 = vmul.f32 %v1182_v56, %v620_v54  ;;  %vm628_vm8 = vweird.f32 %v1182_v56 }
 0x13d   : > { %1183 = vrcp.f32 %v621_v57  ;;  %vm629_vm10 = vmor %vm627_vm9, %vm628_vm8  ;;  %v648_v5 = vand.u32 2147483648, %v621_v57  ;;  %v646_v8 = vand.u32 2147483647, %v621_v57  ;;  %vm642_vm13 = vweird.f32 %v621_v57 }
 0x13e   : > { %v624_v59 = vsub.f32 1.0, %v623_v58  ;;  %1185 = vrcp.f32 %v1264_v25  ;;  %v1113_v25 = vld [vmem:[%s1538_s12 + $0x8] sm:$0xff] }
 0x13f   : > { %v649_v12 = vor.u32 1.1754944e-38, %v648_v5  ;;  %vm647_vm15 = vcmp.eq.f32.partialorder %v646_v8, 8.507059e+37 }
 0x140   : > { %v625_v60 = vmul.f32 %v1182_v56, %v624_v59 }
 0x142   : > { %v626_v62 = vadd.f32 %v1182_v56, %v625_v60 }
 0x143   : > { %v1184_v61 = vpop.eup %1183 }
 0x144   : > { %v638_v63 = vmul.f32 %v1184_v61, %v621_v57  ;;  %v630_v6 = vsel %vm629_vm10, %v1182_v56, %v626_v62  ;;  %vm643_vm11 = vweird.f32 %v1184_v61  ;;  %v1186_v31 = vpop.eup %1185  ;;  %v1165_v57 = vld [vmem:[%s1533_s7] ss:$0 sm:$0xff] }
 0x145   : > { %v635_v11 = vsel %vm632_vm12, %v634_v9, %v630_v6  ;;  %vm644_vm14 = vmor %vm642_vm13, %vm643_vm11  ;;  %v757_v32 = vmul.f32 64.0, %v1186_v31  ;;  %vm761_vm3 = vweird.f32 %v1186_v31  ;;  %v1167_v6 = vld [vmem:[%s1537_s11] ss:$0 sm:$0xff] }
 0x146   : > { %v639_v4 = vsub.f32 1.0, %v638_v63  ;;  %v652_v15 = vmul.f32 %v635_v11, %v612_v45 }
 0x147   : > { %v758_v33 = vsub.f32 1.0, %v757_v32 }
 0x148   : > { %v640_v7 = vmul.f32 %v1184_v61, %v639_v4 }
 0x149   : > { %v759_v34 = vmul.f32 %v1186_v31, %v758_v33  ;;  %v1112_v33 = vld [vmem:[%s1538_s12] sm:$0xff] }
 0x14a   : > { %v641_v10 = vadd.f32 %v1184_v61, %v640_v7  ;;  %v1168_v7 = vld [vmem:[%s1535_s9] ss:$0 sm:$0xff] }
 0x14b   : > { %v760_v35 = vadd.f32 %v1186_v31, %v759_v34 }
 0x14c   : > { %v645_v13 = vsel %vm644_vm14, %v1184_v61, %v641_v10  ;;  %v1115_v10 = vld [vmem:[%s1538_s12 + $0x18] sm:$0xff] }
 0x14d   : > { %v650_v14 = vsel %vm647_vm15, %v649_v12, %v645_v13  ;;  %v762_v36 = vsel %vm761_vm3, %v1186_v31, %v760_v35  ;;  %903 = vmatpush.bf16.msra.mxu3 %v1115_v10 }
 0x14e   : > { %v653_v16 = vmul.f32 %v650_v14, %v613_v51 }
 0x150   : > { %v654_v17 = vpack.c.bf16 %v653_v16, %v652_v15 }
 0x152   : > { %1064 = vmatmul.msk.bf16.vlgmr.msra.gmra.mxu0 %vm550_vm0, %v654_v17 }
 0x1a3   : > { %v718_v59 = vpop.f32.mrf.mxu1 }
 0x1a4   : > { %v719_v63 = vadd.f32 %v1165_v57, %v718_v59 }
 0x1a6   : > { %v813_v12 = vadd.f32 1.0, %v719_v63  ;;  %v1169_v63 = vld [vmem:[%s1541_s15] ss:$0 sm:$0xff] }
 0x1a9   : > { %v744_v9 = vpop.f32.mrf.mxu2 }
 0x1aa   : > { %v745_v15 = vadd.f32 %v1168_v7, %v744_v9 }
 0x1ab   : > { %v720_v17 = vpop.f32.mrf.mxu1 }
 0x1b1   : > { %v746_v28 = vpop.f32.mrf.mxu2 }
 0x1b2   : > { %v747_v35 = vadd.f32 %v1168_v7, %v746_v28 }
 0x1cf   : > { %v687_v19 = vpop.f32.mrf.mxu0 }
 0x1d0   : > { %v688_v20 = vadd.f32 %v1164_v18, %v687_v19 }
 0x1d2   : > { %v750_v21 = vsel %vm749_vm1, %v688_v20, 0.0 }
 0x1d3   : > { %751 = vadd.xlane.f32.xlu2 %v750_v21  ;;  %v1117_v21 = vld [vmem:[%s1540_s14 + $0x8] sm:$0xff] }
 0x1d4   : > { %943 = vmatpush.bf16.msrb.mxu1 %v1117_v21 }
 0x1d7   : > { %v689_v22 = vpop.f32.mrf.mxu0 }
 0x1d8   : > { %v690_v23 = vadd.f32 %v1164_v18, %v689_v22  ;;  %v1114_v18 = vld [vmem:[%s1538_s12 + $0x10] sm:$0xff]  ;;  %944 = vmatpush.bf16.msrb.mxu1 %v1116_v29 }
 0x1d9   : > { %904 = vmatpush.bf16.msra.mxu3 %v1114_v18 }
 0x1da   : > { %v753_v24 = vsel %vm749_vm1, %v690_v23, 0.0 }
 0x1db   : > { %754 = vadd.xlane.f32.xlu2 %v753_v24  ;;  %1102 = vmatmul.msk.bf16.vlgmr.msrb.gmra.mxu1 %vm550_vm0, %v913_v30 }
 0x1dd   : > { %905 = vmatpush.bf16.msra.mxu3 %v1113_v25 }
 0x1e1   : > { %906 = vmatpush.bf16.msra.mxu3 %v1112_v33 }
 0x246   : > { %v752_v37 = vpop.xlane.xlu2 %751 }
 0x247   : > { %v763_v38 = vmul.f32 %v762_v36, %v752_v37 }
 0x249   : > { %v765_v39 = vsub.f32 %v688_v20, %v763_v38 }
 0x24b   : > { %v767_v40 = vmul.f32 %v765_v39, %v765_v39 }
 0x24d   : > { %v769_v41 = vsel %vm749_vm1, %v767_v40, 0.0 }
 0x24e   : > { %770 = vadd.xlane.f32.xlu0 %v769_v41  ;;  %v755_v42 = vpop.xlane.xlu2 %754 }
 0x24f   : > { %v764_v43 = vmul.f32 %v762_v36, %v755_v42 }
 0x251   : > { %v766_v44 = vsub.f32 %v690_v23, %v764_v43  ;;  %v721_v23 = vadd.f32 %v1165_v57, %v720_v17 }
 0x253   : > { %v768_v45 = vmul.f32 %v766_v44, %v766_v44  ;;  %v814_v32 = vadd.f32 1.0, %v721_v23 }
 0x255   : > { %v772_v46 = vsel %vm749_vm1, %v768_v45, 0.0 }
 0x256   : > { %773 = vadd.xlane.f32.xlu1 %v772_v46 }
 0x2c1   : > { %v771_v47 = vpop.xlane.xlu0 %770 }
 0x2c2   : > { %v775_v48 = vmul.f32 %v771_v47, %v762_v36 }
 0x2c4   : > { %v777_v49 = vadd.f32 1e-05, %v775_v48 }
 0x2c6   : > { %1187 = vrsqrt.f32 %v777_v49  ;;  %vm785_vm5 = vweird.f32 %v777_v49 }
 0x2c9   : > { %v774_v50 = vpop.xlane.xlu1 %773 }
 0x2ca   : > { %v776_v51 = vmul.f32 %v774_v50, %v762_v36 }
 0x2cc   : > { %v1188_v52 = vpop.eup %1187  ;;  %v778_v53 = vadd.f32 1e-05, %v776_v51 }
 0x2cd   : > { %v780_v54 = vmul.f32 %v1188_v52, %v777_v49  ;;  %vm786_vm4 = vweird.f32 %v1188_v52 }
 0x2ce   : > { %1189 = vrsqrt.f32 %v778_v53  ;;  %vm787_vm6 = vmor %vm785_vm5, %vm786_vm4  ;;  %vm795_vm8 = vweird.f32 %v778_v53 }
 0x2cf   : > { %v781_v55 = vmul.f32 %v1188_v52, %v780_v54 }
 0x2d1   : > { %v782_v56 = vmul.f32 0.5, %v781_v55 }
 0x2d3   : > { %v783_v58 = vsub.f32 1.5, %v782_v56 }
 0x2d4   : > { %v1190_v60 = vpop.eup %1189 }
 0x2d5   : > { %v784_v61 = vmul.f32 %v1188_v52, %v783_v58  ;;  %v790_v62 = vmul.f32 %v1190_v60, %v778_v53  ;;  %vm796_vm7 = vweird.f32 %v1190_v60 }
 0x2d6   : > { %vm797_vm9 = vmor %vm795_vm8, %vm796_vm7 }
 0x2d7   : > { %v788_v3 = vsel %vm787_vm6, %v1188_v52, %v784_v61  ;;  %v791_v4 = vmul.f32 %v1190_v60, %v790_v62 }
 0x2d8   : > { %v799_v5 = vmul.f32 %v788_v3, %v765_v39  ;;  %v1170_v3 = vld [vmem:[%s1539_s13] ss:$0 sm:$0xff] }
 0x2d9   : > { %v792_v8 = vmul.f32 0.5, %v791_v4 }
 0x2da   : > { %v805_v11 = vmul.f32 %v1166_v1, %v799_v5 }
 0x2db   : > { %v793_v13 = vsub.f32 1.5, %v792_v8 }
 0x2dc   : > { %v811_v14 = vadd.f32 %v1167_v6, %v805_v11 }
 0x2dd   : > { %v794_v16 = vmul.f32 %v1190_v60, %v793_v13 }
 0x2de   : > { %v815_v19 = vmul.f32 %v813_v12, %v811_v14 }
 0x2df   : > { %v798_v20 = vsel %vm797_vm9, %v1190_v60, %v794_v16 }
 0x2e0   : > { %v817_v22 = vadd.f32 %v815_v19, %v745_v15  ;;  %v800_v24 = vmul.f32 %v798_v20, %v766_v44 }
 0x2e2   : > { %v1075_v26 = vmul.f32 -1.442695, %v817_v22  ;;  %v806_v27 = vmul.f32 %v1166_v1, %v800_v24  ;;  %v946_v1 = vpop.f32.mrf.mxu1 }
 0x2e3   : > { %v947_v4 = vadd.f32 %v1169_v63, %v946_v1 }
 0x2e4   : > { %1191 = vpow2.f32 %v1075_v26  ;;  %v812_v31 = vadd.f32 %v1167_v6, %v806_v27 }
 0x2e6   : > { %v816_v34 = vmul.f32 %v814_v32, %v812_v31 }
 0x2e8   : > { %v818_v36 = vadd.f32 %v816_v34, %v747_v35 }
 0x2ea   : > { %v1192_v37 = vpop.eup %1191  ;;  %v1076_v38 = vmul.f32 -1.442695, %v818_v36  ;;  %v948_v8 = vpop.f32.mrf.mxu1 }
 0x2eb   : > { %v825_v39 = vadd.f32 1.0, %v1192_v37  ;;  %v949_v10 = vadd.f32 %v1169_v63, %v948_v8 }
 0x2ec   : > { %1193 = vpow2.f32 %v1076_v38 }
 0x2ed   : > { %1195 = vrcp.f32 %v825_v39  ;;  %v838_v47 = vand.u32 2147483648, %v825_v39  ;;  %vm832_vm11 = vweird.f32 %v825_v39  ;;  %v836_v48 = vand.u32 2147483647, %v825_v39 }
 0x2ef   : > { %v839_v54 = vor.u32 1.1754944e-38, %v838_v47  ;;  %vm837_vm13 = vcmp.eq.f32.partialorder %v836_v48, 8.507059e+37 }
 0x2f2   : > { %v1194_v0 = vpop.eup %1193 }
 0x2f3   : > { %v1196_v2 = vpop.eup %1195  ;;  %v826_v40 = vadd.f32 1.0, %v1194_v0 }
 0x2f4   : > { %v828_v41 = vmul.f32 %v1196_v2, %v825_v39  ;;  %vm833_vm10 = vweird.f32 %v1196_v2 }
 0x2f5   : > { %1197 = vrcp.f32 %v826_v40  ;;  %vm834_vm0 = vmor %vm832_vm11, %vm833_vm10  ;;  %v853_v50 = vand.u32 2147483648, %v826_v40  ;;  %v851_v53 = vand.u32 2147483647, %v826_v40  ;;  %vm847_vm14 = vweird.f32 %v826_v40 }
 0x2f6   : > { %v829_v42 = vsub.f32 1.0, %v828_v41 }
 0x2f7   : > { %v854_v57 = vor.u32 1.1754944e-38, %v853_v50  ;;  %vm852_vm2 = vcmp.eq.f32.partialorder %v851_v53, 8.507059e+37 }
 0x2f8   : > { %v830_v43 = vmul.f32 %v1196_v2, %v829_v42 }
 0x2fa   : > { %v831_v45 = vadd.f32 %v1196_v2, %v830_v43 }
 0x2fb   : > { %v1198_v44 = vpop.eup %1197 }
 0x2fc   : > { %v843_v46 = vmul.f32 %v1198_v44, %v826_v40  ;;  %v835_v51 = vsel %vm834_vm0, %v1196_v2, %v831_v45  ;;  %vm848_vm12 = vweird.f32 %v1198_v44 }
 0x2fd   : > { %v840_v56 = vsel %vm837_vm13, %v839_v54, %v835_v51  ;;  %vm849_vm15 = vmor %vm847_vm14, %vm848_vm12 }
 0x2fe   : > { %v844_v49 = vsub.f32 1.0, %v843_v46  ;;  %v857_v60 = vmul.f32 %v840_v56, %v817_v22 }
 0x300   : > { %v845_v52 = vmul.f32 %v1198_v44, %v844_v49 }
 0x302   : > { %v846_v55 = vadd.f32 %v1198_v44, %v845_v52 }
 0x304   : > { %v850_v58 = vsel %vm849_vm15, %v1198_v44, %v846_v55 }
 0x305   : > { %v855_v59 = vsel %vm852_vm2, %v854_v57, %v850_v58 }
 0x306   : > { %v858_v61 = vmul.f32 %v855_v59, %v818_v36 }
 0x308   : > { %v859_v62 = vpack.c.bf16 %v858_v61, %v857_v60 }
 0x30a   : > { %1093 = vmatmul.msk.bf16.vlgmr.msra.gmra.mxu3 %vm749_vm1, %v859_v62 }
 0x38d   : > { %v908_v5 = vpop.f32.mrf.mxu3 }
 0x38e   : > { %v909_v6 = vadd.f32 %v1170_v3, %v908_v5 }
 0x390   : > { %v951_v7 = vadd.f32 %v947_v4, %v909_v6 }
 0x392   : > { %953 = vst.msk [vmem:[%s531_s5] sm:$0xff] %vm749_vm1, %v951_v7 }
 0x395   : > { %v910_v9 = vpop.f32.mrf.mxu3 }
 0x396   : > { %v911_v11 = vadd.f32 %v1170_v3, %v910_v9 }
 0x398   : > { %v952_v12 = vadd.f32 %v949_v10, %v911_v11 }
 0x39a   : > { %954 = vst.msk [vmem:[%s531_s5 + $0x8] sm:$0xff] %vm749_vm1, %v952_v12 }
 0x39b   : > { %1226 = shalt.err (!%p1223_p3)
}
 0x39c   : > { %s1265_s5 = smov 128   ;;  %s1266_s19 = smov 8  }
 0x39d   : > { %1119 = dma.vmem_to_hbm [thread:$0]  (%p1390_p5), %s969_s4, 256, %s971_s18, %s956_s25, %s1265_s5, %s1265_s5, %s1266_s19  }
 0x39e PF: > { %p1125_p4 = scmp.ge.s32.totalorder %s1261_s24, 2  ;;  %s985_s20 = sand.u32 1, %s1249_s21  }
 0x39f   : > { %s986_s26 = scalar_lea.sflag [#allocation3], %s985_s20 }
 0x3a0   : > { %p1122_p7 = pnand %p1125_p4, %p1394_p6 }
 0x3a2   : > { %p1123_p8 = pneg %p1122_p7 }
 0x3a4   : > { %1244 = dma.done.wait (%p1123_p8), %s986_s26, 256  }
 0x3a5   : > { %1246 = vsyncadd (%p1123_p8), %s986_s26, 4294967040  ;;  %p26_p9 = scmp.ge.s32.totalorder %s1377_s27, 6   ;;  %s1557_s21 = smov %s1253_s22 }
 0x3a6   : > { %s1558_s22 = smov %s1257_s23  ;;  %s1559_s23 = smov %s1388_s30 }
 0x3a7   : > { %s1560_s24 = smov %s1377_s27  ;;  %28 = sbr.rel (!%p26_p9) target bundleno = 10 (0xa), region = 122 }
 0x3ac   :  { %992 = vsyncpa [#allocation3], 1 }
 0x3ad   :  { %994 = vsyncpa [#allocation3 + $0x1], 1 }

</bundles_post_ra>
